<compile_context>
chip_gen: v6e
topology: v6e:2x2x1
jax: 0.10.0
libtpu: 0.0.40
codegen_flags: <defaults>
</compile_context>

<pallas_src>
import functools

import jax
import jax.numpy as jnp
from jax.experimental import pallas as pl
from jax.experimental.pallas import tpu as pltpu


def _round_up(x, m):
    return ((x + m - 1) // m) * m


def prenorm_kernel(x_ref, gamma_ref, beta_ref, wt_ref, b_ref, o_ref, *, d_real):
    """LayerNorm over the last axis, then y @ W^T + b, for one row tile."""
    x_in = x_ref[...]
    x = x_in.astype(jnp.float32)

    # LayerNorm statistics in f32.  The feature axis may be zero-padded to a
    # lane multiple; padding contributes 0 to both moments, so dividing by the
    # real feature count gives the exact unpadded mean/variance.
    inv_d = jnp.float32(1.0 / d_real)
    s1 = jnp.sum(x, axis=-1, keepdims=True)
    s2 = jnp.sum(x * x, axis=-1, keepdims=True)
    mean = s1 * inv_d
    var = jnp.maximum(s2 * inv_d - mean * mean, 0.0)
    inv_std = jax.lax.rsqrt(var + 1e-5)          # eps = 1e-5 (nn.LayerNorm default)

    y = (x - mean) * inv_std
    # gamma/beta are zero-padded -> y is exactly 0 in the padded columns.
    y = y * gamma_ref[...].astype(jnp.float32) + beta_ref[...].astype(jnp.float32)

    # fn = Linear(dim, dim): feed the MXU operands in the input dtype
    # (bf16 stays bf16 for full MXU throughput) and accumulate in f32.
    out = jnp.dot(y.astype(x_in.dtype), wt_ref[...],
                  preferred_element_type=jnp.float32)
    out = out + b_ref[...].astype(jnp.float32)
    o_ref[...] = out.astype(o_ref.dtype)


def prenorm(x, gamma, beta, weight, bias, *, block_rows=256):
    """x: (B, N, D) channels-last tokens.  gamma/beta: (D,) LayerNorm params.
    weight: (D, D) PyTorch-style (out, in), bias: (D,).
    Returns Linear(LayerNorm(x))."""
    B, N, D = x.shape
    R = B * N

    # --- lane-dense feature padding (multiple of 128) ----------------------
    Dp = _round_up(D, 128)
    x2 = x.reshape(R, D)
    wt = weight.T                                  # applied as y @ W^T : (in, out)
    if Dp != D:
        pad = Dp - D
        x2 = jnp.pad(x2, ((0, 0), (0, pad)))
        gamma = jnp.pad(gamma, (0, pad))
        beta = jnp.pad(beta, (0, pad))
        bias = jnp.pad(bias, (0, pad))
        wt = jnp.pad(wt, ((0, pad), (0, pad)))
    gamma2 = gamma.reshape(1, Dp)
    beta2 = beta.reshape(1, Dp)
    bias2 = bias.reshape(1, Dp)

    # --- row-tile sizing under a conservative VMEM budget -------------------
    # 2x input tile + 2x output tile (double-buffered) + f32 temporaries, with
    # the (Dp, Dp) weight kept resident (constant index_map -> single DMA).
    budget = 24 * 1024 * 1024
    per_row = Dp * (4 * x.dtype.itemsize + 2 * 4)
    avail = budget - 2 * Dp * Dp * wt.dtype.itemsize - 3 * Dp * 4
    if avail > 0:
        block_rows = min(block_rows, max(8, (avail // per_row) // 8 * 8))
    block_rows = min(block_rows, _round_up(R, 8))
    # Keep >= 2 grid steps when there is enough work (v7x has 2 TensorCores).
    if _round_up(R, block_rows) == block_rows and R >= 16:
        block_rows = _round_up(pl.cdiv(R, 2), 8)
    R_pad = _round_up(R, block_rows)
    if R_pad != R:
        x2 = jnp.pad(x2, ((0, R_pad - R), (0, 0)))   # zero rows: finite, sliced off
    grid = (R_pad // block_rows,)

    # Only raise the scoped VMEM limit when the tiles actually need it.
    est_vmem = (4 * block_rows * Dp * x.dtype.itemsize      # in/out double-buffers
                + 2 * Dp * Dp * wt.dtype.itemsize           # weight buffers
                + 2 * block_rows * Dp * 4                   # f32 temporaries
                + 3 * Dp * 4)                               # gamma/beta/bias
    cp_kwargs = dict(dimension_semantics=("parallel",))
    if est_vmem > 16 * 1024 * 1024:
        cp_kwargs["vmem_limit_bytes"] = min(
            _round_up(int(est_vmem * 1.25), 1 << 20), 48 * 1024 * 1024)

    kernel = functools.partial(prenorm_kernel, d_real=D)
    out = pl.pallas_call(
        kernel,
        out_shape=jax.ShapeDtypeStruct((R_pad, Dp), x.dtype),
        grid_spec=pl.GridSpec(
            grid=grid,
            in_specs=[
                pl.BlockSpec((block_rows, Dp), lambda i: (i, 0)),  # x tile
                pl.BlockSpec((1, Dp), lambda i: (0, 0)),           # gamma
                pl.BlockSpec((1, Dp), lambda i: (0, 0)),           # beta
                # constant index_map: W^T is DMA'd once and stays resident
                pl.BlockSpec((Dp, Dp), lambda i: (0, 0)),          # W^T
                pl.BlockSpec((1, Dp), lambda i: (0, 0)),           # bias
            ],
            out_specs=pl.BlockSpec((block_rows, Dp), lambda i: (i, 0)),
        ),
        compiler_params=pltpu.CompilerParams(**cp_kwargs),
    )(x2, gamma2, beta2, wt, bias2)
    return out[:R, :D].reshape(B, N, D)


def prenorm_reference(x, gamma, beta, weight, bias):
    x32 = x.astype(jnp.float32)
    mean = jnp.mean(x32, axis=-1, keepdims=True)
    var = jnp.mean((x32 - mean) ** 2, axis=-1, keepdims=True)
    xn = (x32 - mean) * jax.lax.rsqrt(var + 1e-5)
    y = xn * gamma.astype(jnp.float32) + beta.astype(jnp.float32)
    out = y @ weight.T.astype(jnp.float32) + bias.astype(jnp.float32)
    return out.astype(x.dtype)


if __name__ == "__main__":
    key = jax.random.PRNGKey(0)
    B, N, D = 2, 8, 32   # batch=2, seq=8, hidden=32 (small CoAtNet-like block)

    kx, kg, kb, kw, kbb = jax.random.split(key, 5)
    x = jax.random.normal(kx, (B, N, D), dtype=jnp.float32)
    # deterministic synthetic parameters (not a checkpoint)
    gamma = 1.0 + 0.1 * jax.random.normal(kg, (D,), dtype=jnp.float32)
    beta = 0.1 * jax.random.normal(kb, (D,), dtype=jnp.float32)
    weight = jax.random.normal(kw, (D, D), dtype=jnp.float32) / jnp.sqrt(D)
    bias = 0.05 * jax.random.normal(kbb, (D,), dtype=jnp.float32)

    out = prenorm(x, gamma, beta, weight, bias)
    out = jax.block_until_ready(out)

    ref = prenorm_reference(x, gamma, beta, weight, bias)
    assert out.shape == ref.shape
    assert jnp.allclose(out, ref, atol=2e-4, rtol=2e-4), "mismatch vs reference"

    print("KERNEL_OK")
</pallas_src>

<mosaic_0001>
module attributes {stable_mosaic.version = 11 : i64} {
  func.func @prenorm_kernel(%arg0: i32, %arg1: memref<8x128xf32, #tpu.memory_space<vmem>>, %arg2: memref<1x128xf32, #tpu.memory_space<vmem>>, %arg3: memref<1x128xf32, #tpu.memory_space<vmem>>, %arg4: memref<128x128xf32, #tpu.memory_space<vmem>>, %arg5: memref<1x128xf32, #tpu.memory_space<vmem>>, %arg6: memref<8x128xf32, #tpu.memory_space<vmem>>) attributes {dimension_semantics = [#tpu.dimension_semantics<parallel>], iteration_bounds = array<i64: 2>, scalar_prefetch = 0 : i64, scratch_operands = 0 : i64, tpu.core_type = #tpu.core_type<tc>, window_params = [{transform_indices = @transform_0, window_bounds = array<i64: 8, 128>}, {pipeline_mode = #tpu.pipeline_mode<synchronous>, transform_indices = @transform_1, window_bounds = array<i64: 1, 128>}, {pipeline_mode = #tpu.pipeline_mode<synchronous>, transform_indices = @transform_2, window_bounds = array<i64: 1, 128>}, {pipeline_mode = #tpu.pipeline_mode<synchronous>, transform_indices = @transform_3, window_bounds = array<i64: 128, 128>}, {pipeline_mode = #tpu.pipeline_mode<synchronous>, transform_indices = @transform_4, window_bounds = array<i64: 1, 128>}, {transform_indices = @transform_5, window_bounds = array<i64: 8, 128>}]} {
    %c0 = arith.constant 0 : index
    %c0_0 = arith.constant 0 : index
    %0 = vector.load %arg1[%c0, %c0_0] : memref<8x128xf32, #tpu.memory_space<vmem>>, vector<8x128xf32>
    %cst = arith.constant dense<0.000000e+00> : vector<8xf32>
    %1 = vector.multi_reduction <add>, %0, %cst [1] : vector<8x128xf32> to vector<8xf32>
    %2 = vector.shape_cast %1 : vector<8xf32> to vector<8x1xf32>
    %3 = arith.mulf %0, %0 : vector<8x128xf32>
    %cst_1 = arith.constant dense<0.000000e+00> : vector<8xf32>
    %4 = vector.multi_reduction <add>, %3, %cst_1 [1] : vector<8x128xf32> to vector<8xf32>
    %5 = vector.shape_cast %4 : vector<8xf32> to vector<8x1xf32>
    %cst_2 = arith.constant 3.125000e-02 : f32
    %6 = vector.broadcast %cst_2 : f32 to vector<8x1xf32>
    %7 = arith.mulf %2, %6 : vector<8x1xf32>
    %cst_3 = arith.constant 3.125000e-02 : f32
    %8 = vector.broadcast %cst_3 : f32 to vector<8x1xf32>
    %9 = arith.mulf %5, %8 : vector<8x1xf32>
    %10 = arith.mulf %7, %7 : vector<8x1xf32>
    %11 = arith.subf %9, %10 : vector<8x1xf32>
    %cst_4 = arith.constant 0.000000e+00 : f32
    %12 = vector.broadcast %cst_4 : f32 to vector<8x1xf32>
    %13 = arith.maximumf %11, %12 : vector<8x1xf32>
    %cst_5 = arith.constant 9.99999974E-6 : f32
    %14 = vector.broadcast %cst_5 : f32 to vector<8x1xf32>
    %15 = arith.addf %13, %14 : vector<8x1xf32>
    %16 = math.rsqrt %15 : vector<8x1xf32>
    %17 = vector.broadcast %7 : vector<8x1xf32> to vector<8x128xf32>
    %18 = arith.subf %0, %17 : vector<8x128xf32>
    %19 = vector.broadcast %16 : vector<8x1xf32> to vector<8x128xf32>
    %20 = arith.mulf %18, %19 : vector<8x128xf32>
    %c0_6 = arith.constant 0 : index
    %c0_7 = arith.constant 0 : index
    %21 = vector.load %arg2[%c0_6, %c0_7] : memref<1x128xf32, #tpu.memory_space<vmem>>, vector<1x128xf32>
    %22 = vector.broadcast %21 : vector<1x128xf32> to vector<8x128xf32>
    %23 = arith.mulf %20, %22 : vector<8x128xf32>
    %c0_8 = arith.constant 0 : index
    %c0_9 = arith.constant 0 : index
    %24 = vector.load %arg3[%c0_8, %c0_9] : memref<1x128xf32, #tpu.memory_space<vmem>>, vector<1x128xf32>
    %25 = vector.broadcast %24 : vector<1x128xf32> to vector<8x128xf32>
    %26 = arith.addf %23, %25 : vector<8x128xf32>
    %c0_10 = arith.constant 0 : index
    %c0_11 = arith.constant 0 : index
    %27 = vector.load %arg4[%c0_10, %c0_11] : memref<128x128xf32, #tpu.memory_space<vmem>>, vector<128x128xf32>
    %cst_12 = arith.constant dense<0.000000e+00> : vector<8x128xf32>
    %28 = tpu.matmul %26, %27, %cst_12 {dimension_numbers = #tpu.dot_dimension_numbers<[1], [0], [0], [1], [0, 0, 1, 1], [], []>} : vector<8x128xf32>, vector<128x128xf32>, vector<8x128xf32> -> vector<8x128xf32>
    %c0_13 = arith.constant 0 : index
    %c0_14 = arith.constant 0 : index
    %29 = vector.load %arg5[%c0_13, %c0_14] : memref<1x128xf32, #tpu.memory_space<vmem>>, vector<1x128xf32>
    %30 = vector.broadcast %29 : vector<1x128xf32> to vector<8x128xf32>
    %31 = arith.addf %28, %30 : vector<8x128xf32>
    %c0_15 = arith.constant 0 : index
    %c0_16 = arith.constant 0 : index
    %32 = vector.load %arg6[%c0_15, %c0_16] : memref<8x128xf32, #tpu.memory_space<vmem>>, vector<8x128xf32>
    tpu.vector_store %arg6[%c0_15, %c0_16], %31 {strides = array<i32>} : memref<8x128xf32, #tpu.memory_space<vmem>>, vector<8x128xf32>,
    return
  }
  func.func @transform_0(%arg0: i32) -> (i32, i32) {
    %c0_i32 = arith.constant 0 : i32
    %c0_i32_0 = arith.constant 0 : i32
    return %arg0, %c0_i32 : i32, i32
  }
  func.func @transform_1(%arg0: i32) -> (i32, i32) {
    %c0_i32 = arith.constant 0 : i32
    %c0_i32_0 = arith.constant 0 : i32
    %c0_i32_1 = arith.constant 0 : i32
    return %c0_i32, %c0_i32_0 : i32, i32
  }
  func.func @transform_2(%arg0: i32) -> (i32, i32) {
    %c0_i32 = arith.constant 0 : i32
    %c0_i32_0 = arith.constant 0 : i32
    %c0_i32_1 = arith.constant 0 : i32
    return %c0_i32, %c0_i32_0 : i32, i32
  }
  func.func @transform_3(%arg0: i32) -> (i32, i32) {
    %c0_i32 = arith.constant 0 : i32
    %c0_i32_0 = arith.constant 0 : i32
    %c0_i32_1 = arith.constant 0 : i32
    return %c0_i32, %c0_i32_0 : i32, i32
  }
  func.func @transform_4(%arg0: i32) -> (i32, i32) {
    %c0_i32 = arith.constant 0 : i32
    %c0_i32_0 = arith.constant 0 : i32
    %c0_i32_1 = arith.constant 0 : i32
    return %c0_i32, %c0_i32_0 : i32, i32
  }
  func.func @transform_5(%arg0: i32) -> (i32, i32) {
    %c0_i32 = arith.constant 0 : i32
    %c0_i32_0 = arith.constant 0 : i32
    return %arg0, %c0_i32 : i32, i32
  }
}

</mosaic_0001>

<bundles_post_ra>
// kernel: tpu_custom_call.1
= control target key start
LH: loop header
LB: loop body
LE: loop exit
PB: predicated region body
PF: predicated region fallthrough
CT: control target
= control target key end

     0   :  { %10 = vsyncpa [#allocation3], 0  ;;  %s946_s0 = inlined_call_operand.hbm [shape: f32[16,128], index: 0, kind: input, shape index: {}]   ;;  %s947_s1 = inlined_call_operand.vmem [shape: f32[1,128], index: 1, kind: input, shape index: {}]   ;;  %s948_s2 = inlined_call_operand.vmem [shape: f32[1,128], index: 2, kind: input, shape index: {}]   ;;  %s949_s3 = inlined_call_operand.hbm [shape: f32[128,128], index: 3, kind: input, shape index: {}]   ;;  %s950_s4 = inlined_call_operand.vmem [shape: f32[1,128], index: 4, kind: input, shape index: {}]   ;;  %s951_s5 = inlined_call_operand.hbm [shape: f32[16,128], index: 5, kind: output, shape index: {}]  }
   0x1   :  { %12 = vsyncpa [#allocation3 + $0x1], 0 }
   0x2   :  { %13 = vsyncpa [#allocation6], 0 }
   0x3   :  { %14 = vsyncpa [#allocation4], 0 }
   0x4   :  { %16 = vsyncpa [#allocation4 + $0x1], 0  ;;  %s767_s18 = smov 0   ;;  %s769_s19 = smov 0  }
   0x5   :  { %s771_s20 = smov 0   ;;  %s773_s21 = smov 0  }
   0x6 LB: > { %s788_s22 = sadd.s32 4294967295, %s728_s21   ;;  %s474_s23 = sadd.s32 4294967294, %s728_s21   ;;  %s728_s21 = sphi %s773_s21, %s973_s21   ;;  %s724_s20 = sphi %s771_s20, %s972_s20   ;;  %s720_s19 = sphi %s769_s19, %s971_s19   ;;  %s716_s18 = sphi %s767_s18, %s970_s18  }
   0x7   : > { %p42_p0 = scmp.ne.s32.totalorder %s720_s19, %s716_s18  ;;  %p952_p1 = scmp.eq.s32.totalorder %s788_s22, 0 }
   0x8   : > { %p156_p3 = scmp.eq.s32.totalorder %s474_s23, 1  ;;  %p475_p5 = scmp.ge.s32.totalorder %s728_s21, 1 }
   0x9   : > { %p797_p4 = por %p952_p1, %p42_p0  ;;  %p163_p7 = scmp.lt.s32.totalorder %s728_s21, 3 }
   0xa   : > { %p802_p6 = por %p156_p3, %p42_p0  ;;  %s730_s27 = smov [#allocation5]  }
   0xb   : > { %s956_s24 = scalar_select %p797_p4, 1, 0 }
   0xc   : > { %s957_s25 = scalar_select %p802_p6, 1, 0 }
   0xd   : > { %p807_p8 = pnand %p475_p5, %p163_p7  ;;  %s181_s28 = sshll.u32 %s730_s27, 4  ;;  %s182_s28 = int_to_ptr.vmem [resolvable:$true] %s181_s28 }
   0xe   : > { %s821_s30 = sadd.s32 1, %s728_s21   ;;  %s29_s6 = sadd.s32 1, %s724_s20 }
   0xf   : > { %s958_s26 = scalar_select %p807_p8, 1, 0 }
  0x10   : > { %p551_p9 = pneg %p807_p8  ;;  %s26_s7 = ssub.s32 %s728_s21, %s821_s30 }
  0x11   : > { %s617_s8 = scalar_lea.vmem %s182_s28, 2048  ;;  %p625_p5 = scmp.lt.s32.totalorder %s182_s28, %s182_s28 }
  0x12   : > { %p816_p11 = pnand %p551_p9, %p952_p1  ;;  %p618_p13 = scmp.ne.s32.totalorder %s182_s28, %s617_s8 }
  0x13   : > { %p626_p7 = scmp.lt.s32.totalorder %s617_s8, %s617_s8 }
  0x14   : > { %p608_p12 = pneg %p816_p11 }
  0x15   : > { %p627_p10 = por %p626_p7, %p625_p5 }
  0x16   : > { %p620_p0 = pnand %p618_p13, %p608_p12 }
  0x18   : > { %p621_p3 = pneg %p620_p0 }
  0x1a   : > { %p628_p2 = pnand %p627_p10, %p621_p3 }
  0x1c   : > { %631 = shalt.err (!%p628_p2)
}
  0x1d   : > { %s731_s9 = smov 128   ;;  %s732_s10 = smov 8  }
  0x1e   : > { %554 = dma.hbm_to_vmem [thread:$0]  (!%p816_p11), %s949_s3, 2048, %s182_s28, [#allocation6], %s731_s9, %s731_s9, %s732_s10  }
  0x1f   : > { %p27_p9 = scmp.eq.s32.totalorder %s26_s7, 0  ;;  %p36_p12 = scmp.ne.s32.totalorder %s724_s20, %s720_s19 }
  0x20   : > { %p37_p10 = scmp.eq.s32.totalorder %s728_s21, 0  ;;  %p564_p2 = scmp.lt.s32.totalorder %s728_s21, 2 }
  0x21   : > { %s838_s13 = scalar_select %p27_p9, %s724_s20, %s29_s6  }
  0x22   : > { %p38_p13 = por %p37_p10, %p36_p12  ;;  %p960_p0 = scmp.eq.s32.totalorder %s788_s22, 1 }
  0x23   : > { %s198_s15 = sand.u32 1, %s724_s20   ;;  %s479_s16 = sshll.u32 %s728_s21, 7 }
  0x24   : > { %p842_p3 = por %p960_p0, %p36_p12  ;;  %s478_s17 = sshll.u32 %s198_s15, 3 }
  0x25   : > { %s851_s29 = scalar_lea.hbm %s946_s0, %s479_s16  ;;  %s202_s28 = scalar_lea.vmem [#allocation2], %s478_s17 }
  0x26   : > { %s961_s14 = scalar_select %p842_p3, 1, 0 }
  0x27   : > { %s209_s6 = sshll.u32 %s202_s28, 4  ;;  %p853_p11 = pnand %p564_p2, %p38_p13  ;;  %s210_s6 = int_to_ptr.vmem [resolvable:$true] %s209_s6 }
  0x28   : > { %s199_s8 = scalar_lea.sflag [#allocation3], %s198_s15  ;;  %s632_s9 = scalar_lea.hbm %s851_s29, 128 }
  0x29   : > { %p633_p5 = scmp.ne.s32.totalorder %s851_s29, %s632_s9  ;;  %p634_p7 = pneg %p853_p11 }
  0x2a   : > { %s637_s12 = scalar_lea.hbm %s946_s0, 256  ;;  %p638_p10 = scmp.lt.s32.totalorder %s851_s29, %s946_s0 }
  0x2b   : > { %p635_p9 = pnand %p634_p7, %p633_p5  ;;  %p639_p2 = scmp.lt.s32.totalorder %s637_s12, %s632_s9 }
  0x2d   : > { %p636_p12 = pneg %p635_p9  ;;  %p640_p13 = por %p639_p2, %p638_p10 }
  0x2f   : > { %p641_p0 = pnand %p640_p13, %p636_p12 }
  0x31   : > { %644 = shalt.err (!%p641_p0)
}
  0x32   : > { %s645_s23 = scalar_lea.vmem %s210_s6, 128  ;;  %s733_s15 = smov [#allocation2]  }
  0x33   : > { %p646_p1 = scmp.ne.s32.totalorder %s210_s6, %s645_s23  ;;  %s650_s27 = sshll.u32 %s733_s15, 4  ;;  %s651_s27 = int_to_ptr.vmem [resolvable:$false] %s650_s27 }
  0x34   : > { %s652_s28 = scalar_lea.vmem %s651_s27, 256  ;;  %p653_p5 = scmp.lt.s32.totalorder %s210_s6, %s651_s27 }
  0x35   : > { %p648_p6 = pnand %p646_p1, %p634_p7  ;;  %p654_p9 = scmp.lt.s32.totalorder %s652_s28, %s645_s23 }
  0x37   : > { %p649_p3 = pneg %p648_p6  ;;  %p655_p4 = por %p654_p9, %p653_p5 }
  0x39   : > { %p656_p8 = pnand %p655_p4, %p649_p3 }
  0x3b   : > { %659 = shalt.err (!%p656_p8)
}
  0x3c   : > { %558 = dma.hbm_to_vmem [thread:$0]  (!%p853_p11), %s851_s29, 128, %s210_s6, %s199_s8  }
  0x3d   : > { %p963_p12 = scmp.ne.s32.totalorder %s958_s26, 0 }
  0x3e   : > { %s874_s9 = sand.u32 (!%p963_p12), 1, %s720_s19   ;;  %p964_p1 = scmp.ne.s32.totalorder (!%p963_p12), %s956_s24, 0 }
  0x3f   : > { %218 = sbr.rel (%p963_p12) target bundleno = 451 (0x1c3), region = 40  ;;  %s481_s10 = sshll.u32 (!%p963_p12), %s874_s9, 3 }
  0x40   : > { %s221_s11 = scalar_lea.sflag (!%p963_p12), [#allocation3], %s874_s9  ;;  %s224_s12 = scalar_lea.vmem (!%p963_p12), [#allocation2], %s481_s10 }
  0x44   : > { %703 = dma.done.wait (%p964_p1), %s221_s11, 128  }
  0x45   : > { %705 = vsyncadd (%p964_p1), %s221_s11, 4294967168  ;;  %p965_p4 = scmp.eq.s32.totalorder %s788_s22, 0 }
  0x47   : > { %707 = dma.done.wait (%p965_p4), [#allocation6], 2048   ;;  %p966_p6 = pmov %p965_p4 }
  0x48   : > { %v888_v0 = vld [vmem:[%s224_s12] sm:$0xff]  ;;  %v734_v2 = vmov 0.0   ;;  %v299_v5 = vld [vmem:[#allocation5 + $0x68] sm:$0xff]  ;;  %v298_v6 = vld [vmem:[#allocation5 + $0x60] sm:$0xff]  ;;  %vm735_vm0 = vmmov 0   ;;  %s488_s16 = sshll.u32 %s788_s22, 7 }
  0x49   : > { %709 = vsyncadd (%p966_p6), [#allocation6], 4294965248  ;;  %256 = vadd.xlane.f32.xlu0 %v888_v0  ;;  %v258_v1 = vmul.f32 %v888_v0, %v888_v0  ;;  %508 = vmatprep.subr.mxu0 %v734_v2  ;;  %v301_v3 = vld [vmem:[#allocation5 + $0x78] sm:$0xff]  ;;  %v300_v4 = vld [vmem:[#allocation5 + $0x70] sm:$0xff]  ;;  %s254_s17 = scalar_lea.vmem [#allocation7], %s481_s10  ;;  %s909_s28 = scalar_lea.hbm %s951_s5, %s488_s16 }
  0x4a   : > { %509 = vmatpush3.msra.mxu0 %v301_v3  ;;  %v297_v7 = vld [vmem:[#allocation5 + $0x58] sm:$0xff]  ;;  %v296_v8 = vld [vmem:[#allocation5 + $0x50] sm:$0xff]  ;;  %v295_v9 = vld [vmem:[#allocation5 + $0x48] sm:$0xff]  ;;  %540 = vmatprep.mubr.msk.f32.mxu0 %vm735_vm0, %v734_v2  ;;  %s394_s23 = sshll.u32 %s254_s17, 4  ;;  %s381_s11 = scalar_lea.sflag [#allocation4], %s874_s9  ;;  %s395_s23 = int_to_ptr.vmem [resolvable:$true] %s394_s23 }
  0x4b   : > { %510 = vmatprep.subr.mxu0 %v734_v2  ;;  %v294_v10 = vld [vmem:[#allocation5 + $0x40] sm:$0xff]  ;;  %v293_v11 = vld [vmem:[#allocation5 + $0x38] sm:$0xff]  ;;  %v292_v12 = vld [vmem:[#allocation5 + $0x30] sm:$0xff]  ;;  %s660_s12 = scalar_lea.vmem %s395_s23, 128  ;;  %p967_p3 = scmp.ne.s32.totalorder %s961_s14, 0 }
  0x4c   : > { %511 = vmatpush3.msra.mxu0 %v300_v4  ;;  %v291_v13 = vld [vmem:[#allocation5 + $0x28] sm:$0xff]  ;;  %v290_v14 = vld [vmem:[#allocation5 + $0x20] sm:$0xff]  ;;  %v289_v15 = vld [vmem:[#allocation5 + $0x18] sm:$0xff]  ;;  %p661_p8 = scmp.ne.s32.totalorder %s395_s23, %s660_s12  ;;  %s736_s22 = smov [#allocation7]  }
  0x4d   : > { %259 = vadd.xlane.f32.xlu0 %v258_v1  ;;  %512 = vmatprep.subr.mxu0 %v734_v2  ;;  %v288_v16 = vld [vmem:[#allocation5 + $0x10] sm:$0xff]  ;;  %v287_v17 = vld [vmem:[#allocation5 + $0x8] sm:$0xff]  ;;  %v286_v18 = vld [vmem:[#allocation5] sm:$0xff]  ;;  %s664_s24 = sshll.u32 %s736_s22, 4  ;;  %s665_s24 = int_to_ptr.vmem [resolvable:$false] %s664_s24 }
  0x4e   : > { %513 = vmatpush3.msra.mxu0 %v299_v5  ;;  %v484_v29 = vld [vmem:[%s947_s1] ss:$0 sm:$0xff]  ;;  %p662_p11 = pnand %p661_p8, %p967_p3  ;;  %s666_s10 = scalar_lea.vmem %s665_s24, 256 }
  0x4f   : > { %514 = vmatprep.subr.mxu0 %v734_v2  ;;  %v485_v31 = vld [vmem:[%s948_s2] ss:$0 sm:$0xff]  ;;  %p667_p10 = scmp.lt.s32.totalorder %s395_s23, %s665_s24  ;;  %p668_p2 = scmp.lt.s32.totalorder %s666_s10, %s660_s12 }
  0x50   : > { %515 = vmatpush3.msra.mxu0 %v298_v6  ;;  %v486_v34 = vld [vmem:[%s950_s4] ss:$0 sm:$0xff]  ;;  %p663_p7 = pneg %p662_p11 }
  0x51   : > { %516 = vmatprep.subr.mxu0 %v734_v2  ;;  %p669_p13 = por %p668_p2, %p667_p10 }
  0x52   : > { %517 = vmatpush3.msra.mxu0 %v297_v7 }
  0x53   : > { %518 = vmatprep.subr.mxu0 %v734_v2  ;;  %p670_p0 = pnand %p669_p13, %p663_p7 }
  0x54   : > { %519 = vmatpush3.msra.mxu0 %v296_v8 }
  0x55   : > { %520 = vmatprep.subr.mxu0 %v734_v2 }
  0x56   : > { %521 = vmatpush3.msra.mxu0 %v295_v9 }
  0x57   : > { %522 = vmatprep.subr.mxu0 %v734_v2 }
  0x58   : > { %523 = vmatpush3.msra.mxu0 %v294_v10 }
  0x59   : > { %524 = vmatprep.subr.mxu0 %v734_v2 }
  0x5a   : > { %525 = vmatpush3.msra.mxu0 %v293_v11 }
  0x5b   : > { %526 = vmatprep.subr.mxu0 %v734_v2 }
  0x5c   : > { %527 = vmatpush3.msra.mxu0 %v292_v12 }
  0x5d   : > { %528 = vmatprep.subr.mxu0 %v734_v2 }
  0x5e   : > { %529 = vmatpush3.msra.mxu0 %v291_v13 }
  0x5f   : > { %530 = vmatprep.subr.mxu0 %v734_v2 }
  0x60   : > { %531 = vmatpush3.msra.mxu0 %v290_v14 }
  0x61   : > { %532 = vmatprep.subr.mxu0 %v734_v2 }
  0x62   : > { %533 = vmatpush3.msra.mxu0 %v289_v15 }
  0x63   : > { %534 = vmatprep.subr.mxu0 %v734_v2 }
  0x64   : > { %535 = vmatpush3.msra.mxu0 %v288_v16 }
  0x65   : > { %536 = vmatprep.subr.mxu0 %v734_v2 }
  0x66   : > { %537 = vmatpush3.msra.mxu0 %v287_v17 }
  0x67   : > { %538 = vmatprep.subr.mxu0 %v734_v2 }
  0x68   : > { %539 = vmatpush3.msra.mxu0 %v286_v18 }
  0xd2   : > { %v257_v19 = vpop.xlane.xlu0 %256 }
  0xd3   : > { %v261_v20 = vmul.f32 0.03125, %v257_v19 }
  0xd5   : > { %v263_v22 = vmul.f32 %v261_v20, %v261_v20  ;;  %v268_v27 = vsub.f32 %v888_v0, %v261_v20 }
  0xd6   : > { %v260_v21 = vpop.xlane.xlu0 %259 }
  0xd7   : > { %v262_v23 = vmul.f32 0.03125, %v260_v21 }
  0xd9   : > { %v264_v24 = vsub.f32 %v262_v23, %v263_v22 }
  0xdb   : > { %v265_v25 = vmax.f32 %v264_v24, 0.0 }
  0xdd   : > { %v266_v26 = vadd.f32 1e-05, %v265_v25 }
  0xdf   : > { %604 = vrsqrt.f32 %v266_v26 }
  0xec   : > { %v605_v28 = vpop.eup %604 }
  0xed   : > { %v269_v30 = vmul.f32 %v605_v28, %v268_v27 }
  0xef   : > { %v277_v32 = vmul.f32 %v484_v29, %v269_v30 }
  0xf1   : > { %v285_v33 = vadd.f32 %v485_v31, %v277_v32 }
  0xf3   : > { %541 = vmatmul.mubr.f32.vlgmr.msra.gmra.mxu0 %v285_v33 }
 0x1b3   : > { %v375_v35 = vpop.f32.mrf.mxu0 }
 0x1b4   : > { %v376_v36 = vadd.f32 %v486_v34, %v375_v35 }
 0x1b5   : > { %v542_v37 = vpop.f32.mrf.mxu0 }
 0x1b6   : > { %379 = vst [vmem:[%s254_s17] sm:$0xff] %v376_v36 }
 0x1b7   : > { %673 = shalt.err (!%p670_p0)
}
 0x1b8   : > { %s674_s26 = scalar_lea.hbm %s909_s28, 128  ;;  %s678_s6 = scalar_lea.hbm %s951_s5, 256 }
 0x1b9   : > { %p675_p5 = scmp.ne.s32.totalorder %s909_s28, %s674_s26  ;;  %p679_p1 = scmp.lt.s32.totalorder %s909_s28, %s951_s5 }
 0x1ba   : > { %p680_p4 = scmp.lt.s32.totalorder %s678_s6, %s674_s26 }
 0x1bb   : > { %p676_p9 = pnand %p675_p5, %p967_p3 }
 0x1bc   : > { %p681_p6 = por %p680_p4, %p679_p1 }
 0x1bd   : > { %p677_p12 = pneg %p676_p9 }
 0x1bf   : > { %p682_p8 = pnand %p681_p6, %p677_p12 }
 0x1c1   : > { %685 = shalt.err (!%p682_p8)
}
 0x1c2   : > { %549 = dma.vmem_to_hbm [thread:$0]  (%p967_p3), %s395_s23, 128, %s909_s28, %s381_s11  }
 0x1c3 PF: > { %s406_s16 = sand.u32 1, %s716_s18   ;;  %p968_p11 = scmp.ne.s32.totalorder %s957_s25, 0 }
 0x1c4   : > { %p969_p7 = scmp.ge.s32.totalorder %s728_s21, 2  ;;  %s407_s17 = scalar_lea.sflag [#allocation4], %s406_s16 }
 0x1c6   : > { %p560_p10 = pnand %p969_p7, %p968_p11 }
 0x1c8   : > { %p561_p2 = pneg %p560_p10 }
 0x1ca   : > { %711 = dma.done.wait (%p561_p2), %s407_s17, 128  }
 0x1cb   : > { %713 = vsyncadd (%p561_p2), %s407_s17, 4294967168  ;;  %p19_p13 = scmp.ge.s32.totalorder %s821_s30, 4   ;;  %s970_s18 = smov %s720_s19 }
 0x1cc   : > { %s971_s19 = smov %s724_s20  ;;  %s972_s20 = smov %s838_s13 }
 0x1cd   : > { %s973_s21 = smov %s821_s30  ;;  %21 = sbr.rel (!%p19_p13) target bundleno = 6 (0x6), region = 89 }
 0x1d2   :  { %412 = vsyncpa [#allocation3], 1 }
 0x1d3   :  { %414 = vsyncpa [#allocation3 + $0x1], 1 }
 0x1d4   :  { %415 = vsyncpa [#allocation6], 1 }
 0x1d5   :  { %416 = vsyncpa [#allocation4], 1 }
 0x1d6   :  { %418 = vsyncpa [#allocation4 + $0x1], 1 }

</bundles_post_ra>
